<compile_context>
chip_gen: v6e
topology: v6e:2x2x1
jax: 0.10.0
libtpu: 0.0.40
codegen_flags: <defaults>
</compile_context>

<pallas_src>
import jax
import jax.numpy as jnp
from jax.experimental import pallas as pl
from jax.experimental.pallas import tpu as pltpu


def _identity_kernel(x_ref, o_ref):
    o_ref[...] = x_ref[...]


def _block_bytes():
    # ~2 MiB blocks by default (>=85% of HBM copy roofline, 4 double-buffered
    # tiles = 8 MiB fits every generation's scoped VMEM).  On v7x the 3.2 TB/s
    # HBM makes the ~0.35us per-step overhead relatively larger, so use ~4 MiB
    # blocks (working set 16 MiB, still well under its 64 MiB physical VMEM).
    try:
        kind = jax.devices()[0].device_kind.lower()
    except Exception:
        kind = ""
    return (4 << 20) if "v7" in kind else (2 << 20)


def _sublane(dtype):
    # Native sublane packing: 8 rows for 4-byte dtypes, 16 for 2-byte, 32 for 1-byte.
    itemsize = jnp.dtype(dtype).itemsize
    return max(8, 32 // max(1, itemsize))


def _widest_lane_dim(n):
    # Largest lane-dense last dim (multiple of 128) dividing n; 0 if none.
    for cand in (2048, 1024, 512, 256, 128):
        if n % cand == 0:
            return cand
    return 0


def pallas_identity_copy(x):
    """Materialized identity copy of x via a single tiled Pallas kernel.

    Only for callers that explicitly need a fresh device buffer; the module's
    forward itself returns x untouched (see print_forward).
    """
    n = x.size
    C = _widest_lane_dim(n) if n else 0
    if C == 0:
        # Empty or size not a multiple of 128: the op is a pure identity, a
        # kernel copy buys nothing -- pass through (no slice/concat tail path).
        return x

    flat2d = x.reshape(n // C, C)
    R = flat2d.shape[0]
    itemsize = jnp.dtype(x.dtype).itemsize
    sub = _sublane(x.dtype)

    # Largest row tile (multiple of the dtype's sublane packing) under budget.
    max_tr = max(sub, (_block_bytes() // (C * itemsize)) // sub * sub)

    # For arrays >= 512 KiB keep the grid multi-step (>= ~4 blocks) so both
    # v7x TensorCores get work and the DMA pipeline stays fed.
    if n * itemsize >= (512 << 10):
        target = max(sub, pl.cdiv(pl.cdiv(R, 4), sub) * sub)
        max_tr = min(max_tr, target)

    # tr is either a sublane multiple (cdiv grid, masked partial last block)
    # or the full row extent (always a legal block shape).
    tr = min(R, max_tr)
    grid = (pl.cdiv(R, tr),)

    out = pl.pallas_call(
        _identity_kernel,
        out_shape=jax.ShapeDtypeStruct((R, C), x.dtype),
        grid_spec=pltpu.PrefetchScalarGridSpec(
            num_scalar_prefetch=0,
            grid=grid,
            in_specs=[pl.BlockSpec((tr, C), lambda i: (i, 0))],
            out_specs=pl.BlockSpec((tr, C), lambda i: (i, 0)),
        ),
        compiler_params=pltpu.CompilerParams(
            dimension_semantics=("parallel",),
            vmem_limit_bytes=32 << 20,
        ),
    )(flat2d)
    return out.reshape(x.shape)


def print_forward(x):
    """Equivalent of Print.forward: prints the input shape and returns x.

    Pure identity -> no kernel launch, no HBM traffic (the optimal path on
    v5e / v6e / v7x alike).
    """
    print("layer input:", tuple(x.shape))
    return x


if __name__ == "__main__":
    key = jax.random.PRNGKey(0)
    # Small NCHW input consistent with a conv-style layer input.
    x = jax.random.normal(key, (2, 4, 16, 16), dtype=jnp.float32)

    # Module-equivalent forward: identity fast path.
    y = jax.block_until_ready(print_forward(x))
    assert y.shape == x.shape and y.dtype == x.dtype
    assert bool(jnp.all(y == x))

    # Exercise the Pallas identity-copy kernel once (materialized-copy path).
    y_copy = jax.block_until_ready(pallas_identity_copy(x))
    assert y_copy.shape == x.shape and y_copy.dtype == x.dtype
    assert bool(jnp.all(y_copy == x))

    print("KERNEL_OK")
</pallas_src>

<mosaic_0001>
module attributes {stable_mosaic.version = 11 : i64} {
  func.func @_identity_kernel(%arg0: i32, %arg1: memref<1x2048xf32, #tpu.memory_space<vmem>>, %arg2: memref<1x2048xf32, #tpu.memory_space<vmem>>) attributes {dimension_semantics = [#tpu.dimension_semantics<parallel>], iteration_bounds = array<i64: 1>, scalar_prefetch = 0 : i64, scratch_operands = 0 : i64, tpu.core_type = #tpu.core_type<tc>, window_params = [{transform_indices = @transform_0, window_bounds = array<i64: 1, 2048>}, {transform_indices = @transform_1, window_bounds = array<i64: 1, 2048>}]} {
    %c0 = arith.constant 0 : index
    %c0_0 = arith.constant 0 : index
    %0 = vector.load %arg1[%c0, %c0_0] : memref<1x2048xf32, #tpu.memory_space<vmem>>, vector<1x2048xf32>
    %c0_1 = arith.constant 0 : index
    %c0_2 = arith.constant 0 : index
    %1 = vector.load %arg2[%c0_1, %c0_2] : memref<1x2048xf32, #tpu.memory_space<vmem>>, vector<1x2048xf32>
    tpu.vector_store %arg2[%c0_1, %c0_2], %0 {strides = array<i32>} : memref<1x2048xf32, #tpu.memory_space<vmem>>, vector<1x2048xf32>,
    return
  }
  func.func @transform_0(%arg0: i32) -> (i32, i32) {
    %c0_i32 = arith.constant 0 : i32
    %c0_i32_0 = arith.constant 0 : i32
    return %arg0, %c0_i32 : i32, i32
  }
  func.func @transform_1(%arg0: i32) -> (i32, i32) {
    %c0_i32 = arith.constant 0 : i32
    %c0_i32_0 = arith.constant 0 : i32
    return %arg0, %c0_i32 : i32, i32
  }
}

</mosaic_0001>

<bundles_post_ra>
// kernel: tpu_custom_call.1
= control target key start
LH: loop header
LB: loop body
LE: loop exit
PB: predicated region body
PF: predicated region fallthrough
CT: control target
= control target key end

     0   :  { %6 = vsyncpa [#allocation3], 0  ;;  %s104_s0 = inlined_call_operand.hbm [shape: f32[1,2048], index: 0, kind: input, shape index: {}]   ;;  %s105_s1 = inlined_call_operand.hbm [shape: f32[1,2048], index: 1, kind: output, shape index: {}]  }
   0x1   :  { %7 = vsyncpa [#allocation4], 0  ;;  %s86_s6 = smov [#allocation2]  }
   0x2   :  { %s14_s7 = sshll.u32 %s86_s6, 4  ;;  %s15_s7 = int_to_ptr.vmem [resolvable:$true] %s14_s7 }
   0x3   :  { %s50_s8 = scalar_lea.vmem %s15_s7, 256  ;;  %p55_p1 = scmp.lt.s32.totalorder %s15_s7, %s15_s7 }
   0x4   :  { %p51_p0 = scmp.ne.s32.totalorder %s15_s7, %s50_s8  ;;  %p56_p2 = scmp.lt.s32.totalorder %s50_s8, %s50_s8 }
   0x6   :  { %p57_p3 = por %p56_p2, %p55_p1 }
   0x8   :  { %p58_p4 = pnand %p57_p3, %p51_p0 }
   0xa   :  { %61 = shalt.err (!%p58_p4)
}
   0xb   :  { %17 = dma.hbm_to_vmem [thread:$0]  %s104_s0, 256, %s15_s7, [#allocation3]  }
   0xc   :  { %82 = dma.done.wait [#allocation3], 256  }
   0xd   :  { %83 = vsyncadd [#allocation3], 4294967040  ;;  %s87_s11 = smov [#allocation5]   ;;  %v21_v0 = vld [vmem:[#allocation2] sm:$0xff]  ;;  %v22_v1 = vld [vmem:[#allocation2 + $0x8] sm:$0xff] }
   0xe   :  { %s31_s12 = sshll.u32 %s87_s11, 4  ;;  %23 = vst [vmem:[#allocation5] sm:$0xff] %v21_v0  ;;  %24 = vst [vmem:[#allocation5 + $0x8] sm:$0xff] %v22_v1  ;;  %s32_s12 = int_to_ptr.vmem [resolvable:$true] %s31_s12 }
   0xf   :  { %s62_s13 = scalar_lea.vmem %s32_s12, 256  ;;  %p67_p6 = scmp.lt.s32.totalorder %s32_s12, %s32_s12 }
  0x10   :  { %p63_p5 = scmp.ne.s32.totalorder %s32_s12, %s62_s13  ;;  %p68_p7 = scmp.lt.s32.totalorder %s62_s13, %s62_s13 }
  0x12   :  { %p69_p8 = por %p68_p7, %p67_p6 }
  0x14   :  { %p70_p9 = pnand %p69_p8, %p63_p5 }
  0x16   :  { %73 = shalt.err (!%p70_p9)
}
  0x17   :  { %34 = dma.vmem_to_hbm [thread:$0]  %s32_s12, 256, %s105_s1, [#allocation4]  }
  0x18   :  { %84 = dma.done.wait [#allocation4], 256  }
  0x19   :  { %85 = vsyncadd [#allocation4], 4294967040 }
  0x1a   :  { %38 = vsyncpa [#allocation3], 1 }
  0x1b   :  { %39 = vsyncpa [#allocation4], 1 }

</bundles_post_ra>
